<compile_context>
chip_gen: v5e
topology: v5e:2x2
jax: 0.10.0
libtpu: 0.0.40
codegen_flags: <defaults>
</compile_context>

<pallas_src>
import functools

import jax
import jax.numpy as jnp
import numpy as np
from jax.experimental import pallas as pl
from jax.experimental.pallas import tpu as pltpu


# -----------------------------------------------------------------------------
# Fused kernel: conditioning channels + EDM diffusion training loss
# -----------------------------------------------------------------------------
def _upsampler_loss_kernel(sig_ref,                        # (B,) f32 scalar prefetch (SMEM)
                           x_ref, noise_ref, sel_ref,      # tiled / resident inputs
                           w1_ref, b1_ref, wt_ref, w2_ref, b2_ref,
                           ch_ref, loss_ref,               # outputs
                           acc_ref,                        # (1,1) VMEM f32 scratch
                           *, sigma_data, inv_total):
    b = pl.program_id(0)
    t = pl.program_id(1)
    nt = pl.num_programs(1)

    # sigma for this batch element: scalar from SMEM -> (1,1) so that the
    # rsqrt / log / divide stay on the well-supported vector (EUP/VPU) path.
    sig = jnp.full((1, 1), sig_ref[b], dtype=jnp.float32)
    sd2 = jnp.float32(sigma_data) * jnp.float32(sigma_data)
    sig2 = sig * sig

    x = x_ref[0].astype(jnp.float32)          # (C, TN)
    noise = noise_ref[0].astype(jnp.float32)  # (C, TN)

    # --- conditioning channels for this time tile (block-diagonal hold-upsample)
    # channels[:, l] = x[:, (l // factor) * factor]   (tile-local; TN % factor == 0)
    ch = jnp.dot(x, sel_ref[...], preferred_element_type=jnp.float32)   # (C, TN)
    ch_ref[0] = ch.astype(ch_ref.dtype)

    # --- EDM / k-diffusion preconditioning
    x_noisy = x + sig * noise
    rinv = jax.lax.rsqrt(sig2 + sd2)
    c_skip = sd2 / (sig2 + sd2)
    c_out = sig * jnp.float32(sigma_data) * rinv
    c_in = rinv
    c_noise = jnp.log(sig) * 0.25

    # --- stand-in conditional denoiser (fused first layer: W1 = [w1a | w1b])
    act = jnp.concatenate([c_in * x_noisy, ch], axis=0)                 # (2C, TN)
    h = (jnp.dot(w1_ref[...], act, preferred_element_type=jnp.float32)
         + b1_ref[...] + c_noise * wt_ref[...])
    h = jax.nn.gelu(h, approximate=True)
    x_pred = jnp.dot(w2_ref[...], h, preferred_element_type=jnp.float32) + b2_ref[...]

    # skip connection + clip (dynamic_threshold == 0.0 -> clamp to [-1, 1])
    x_den = jnp.clip(c_skip * x_noisy + c_out * x_pred, -1.0, 1.0)

    # --- per-batch weighted MSE, accumulated across time tiles
    @pl.when(t == 0)
    def _():
        acc_ref[...] = jnp.zeros_like(acc_ref)

    err = x_den - x
    acc_ref[...] += jnp.sum(err * err)

    @pl.when(t == nt - 1)
    def _():
        loss_w = (sig2 + sd2) / (sig2 * sd2)          # EDM loss weight
        loss_ref[0] = (acc_ref[...] * jnp.float32(inv_total) * loss_w).astype(loss_ref.dtype)


def _pick_time_tile(t, factor, target):
    """Largest lane-aligned tile <= target that divides T and the factor."""
    if t <= target:
        return t
    tn = (target // 128) * 128
    while tn >= 128:
        if t % tn == 0 and tn % factor == 0:
            return tn
        tn -= 128
    return t


def _hold_upsample_matrix(tn, factor):
    """(TN, TN) one-hot: sel[s, l] = 1  iff  s == (l // factor) * factor."""
    src = np.arange(tn).reshape(tn, 1)
    dst = np.arange(tn).reshape(1, tn)
    return jnp.asarray(((dst // factor) * factor == src).astype(np.float32))


def diffusion_upsampler_forward(x, params, key, factor, sigma_data=0.5,
                                sigma_mean=-3.0, sigma_std=1.0, time_tile=512):
    """DiffusionUpsampler1d.forward(x, factor) -> (scalar diffusion loss, channels).

    `random.choice(self.factor)` is replaced by an explicit `factor` argument
    for determinism.  Sigma sampling (LogNormal) and Gaussian noise are plain
    JAX glue; all tensor math runs inside the fused Pallas kernel.
    On v7x (64 MiB VMEM per core) prefer time_tile=256-512; v5e/v6e tolerate
    512-1024.  Demo shapes are tiny either way.
    """
    b, c, t = x.shape
    assert t % factor == 0, "channels only aligns with x when T % factor == 0"

    tn = _pick_time_tile(t, factor, time_tile)
    num_t = t // tn

    # --- glue: sigma ~ LogNormal(mean, std), noise ~ N(0, 1) ---
    k_sig, k_noise = jax.random.split(key)
    sigmas = jnp.exp(sigma_mean + sigma_std * jax.random.normal(k_sig, (b,), jnp.float32))
    noise = jax.random.normal(k_noise, x.shape, jnp.float32)

    # fused first-layer weight [w1a | w1b]  -> (H, 2C)
    w1 = jnp.concatenate([params["w1a"], params["w1b"]], axis=1)
    b1, wt, w2, b2 = params["b1"], params["wt"], params["w2"], params["b2"]
    hdim = w1.shape[0]

    sel = _hold_upsample_matrix(tn, factor)

    kernel = functools.partial(_upsampler_loss_kernel,
                               sigma_data=float(sigma_data),
                               inv_total=1.0 / float(c * t))

    channels, losses = pl.pallas_call(
        kernel,
        out_shape=(jax.ShapeDtypeStruct((b, c, t), x.dtype),      # channels
                   jax.ShapeDtypeStruct((b, 1, 1), jnp.float32)), # per-batch loss
        grid_spec=pltpu.PrefetchScalarGridSpec(
            num_scalar_prefetch=1,                                # sigmas -> SMEM
            grid=(b, num_t),
            in_specs=[
                pl.BlockSpec((1, c, tn), lambda i, j, sig: (i, 0, j)),   # x tile
                pl.BlockSpec((1, c, tn), lambda i, j, sig: (i, 0, j)),   # noise tile
                pl.BlockSpec((tn, tn), lambda i, j, sig: (0, 0)),        # sel (resident)
                pl.BlockSpec((hdim, 2 * c), lambda i, j, sig: (0, 0)),   # W1 = [w1a|w1b]
                pl.BlockSpec((hdim, 1), lambda i, j, sig: (0, 0)),       # b1
                pl.BlockSpec((hdim, 1), lambda i, j, sig: (0, 0)),       # wt
                pl.BlockSpec((c, hdim), lambda i, j, sig: (0, 0)),       # w2
                pl.BlockSpec((c, 1), lambda i, j, sig: (0, 0)),          # b2
            ],
            out_specs=[
                pl.BlockSpec((1, c, tn), lambda i, j, sig: (i, 0, j)),   # channels tile
                pl.BlockSpec((1, 1, 1), lambda i, j, sig: (i, 0, 0)),    # per-batch loss
            ],
            scratch_shapes=[pltpu.VMEM((1, 1), jnp.float32)],            # SSE accumulator
        ),
        compiler_params=pltpu.CompilerParams(
            dimension_semantics=("parallel", "arbitrary"),
            vmem_limit_bytes=32 * 1024 * 1024,
        ),
    )(sigmas, x, noise, sel, w1, b1, wt, w2, b2)

    loss = jnp.mean(losses[:, 0, 0])   # tiny (B,) reduce over batch: glue
    return loss, channels


# -----------------------------------------------------------------------------
# Pure-JAX reference (same math) for validation
# -----------------------------------------------------------------------------
def reference_forward(x, params, key, factor, sigma_data=0.5,
                      sigma_mean=-3.0, sigma_std=1.0):
    b, c, t = x.shape
    ds = x[:, :, ::factor]
    channels = jnp.repeat(ds, factor, axis=2)
    k_sig, k_noise = jax.random.split(key)
    sigmas = jnp.exp(sigma_mean + sigma_std * jax.random.normal(k_sig, (b,), jnp.float32))
    noise = jax.random.normal(k_noise, x.shape, jnp.float32)
    sig = sigmas.reshape(b, 1, 1)
    sd2 = sigma_data ** 2
    x_noisy = x + sig * noise
    c_skip = sd2 / (sig ** 2 + sd2)
    c_out = sig * sigma_data / jnp.sqrt(sig ** 2 + sd2)
    c_in = 1.0 / jnp.sqrt(sig ** 2 + sd2)
    c_noise = jnp.log(sig) * 0.25
    h = (jnp.einsum("hc,bct->bht", params["w1a"], c_in * x_noisy)
         + jnp.einsum("hc,bct->bht", params["w1b"], channels)
         + params["b1"][None] + c_noise * params["wt"][None])
    h = jax.nn.gelu(h, approximate=True)
    x_pred = jnp.einsum("ch,bht->bct", params["w2"], h) + params["b2"][None]
    x_den = jnp.clip(c_skip * x_noisy + c_out * x_pred, -1.0, 1.0)
    losses = jnp.mean((x_den - x) ** 2, axis=(1, 2))
    lw = (sigmas ** 2 + sd2) / (sigmas ** 2 * sd2)
    return jnp.mean(losses * lw), channels


if __name__ == "__main__":
    B, C, T, H = 2, 4, 256, 32          # small demo shapes; T tiled into 2 time tiles
    FACTOR = 2
    SIGMA_DATA = 0.5

    key = jax.random.PRNGKey(0)
    kx, kp, kd = jax.random.split(key, 3)
    x = jax.random.normal(kx, (B, C, T), jnp.float32)

    kw = jax.random.split(kp, 6)
    params = dict(
        w1a=0.1 * jax.random.normal(kw[0], (H, C), jnp.float32),
        w1b=0.1 * jax.random.normal(kw[1], (H, C), jnp.float32),
        b1=0.1 * jax.random.normal(kw[2], (H, 1), jnp.float32),
        wt=0.1 * jax.random.normal(kw[3], (H, 1), jnp.float32),
        w2=0.1 * jax.random.normal(kw[4], (C, H), jnp.float32),
        b2=0.1 * jax.random.normal(kw[5], (C, 1), jnp.float32),
    )

    loss, channels = diffusion_upsampler_forward(
        x, params, kd, FACTOR, SIGMA_DATA, time_tile=128)  # 128-lane tiles -> exercises the T reduction
    loss = jax.block_until_ready(loss)
    channels = jax.block_until_ready(channels)

    ref_loss, ref_channels = reference_forward(x, params, kd, FACTOR, SIGMA_DATA)
    np.testing.assert_allclose(np.asarray(channels), np.asarray(ref_channels),
                               rtol=1e-5, atol=1e-5)
    np.testing.assert_allclose(np.asarray(loss), np.asarray(ref_loss),
                               rtol=1e-4, atol=1e-4)
    print("KERNEL_OK")
</pallas_src>

<mosaic_0001>
module attributes {stable_mosaic.version = 11 : i64} {
  func.func @_upsampler_loss_kernel(%arg0: i32, %arg1: i32, %arg2: memref<2xf32, #tpu.memory_space<smem>>, %arg3: memref<1x4x128xf32, #tpu.memory_space<vmem>>, %arg4: memref<1x4x128xf32, #tpu.memory_space<vmem>>, %arg5: memref<128x128xf32, #tpu.memory_space<vmem>>, %arg6: memref<32x8xf32, #tpu.memory_space<vmem>>, %arg7: memref<32x1xf32, #tpu.memory_space<vmem>>, %arg8: memref<32x1xf32, #tpu.memory_space<vmem>>, %arg9: memref<4x32xf32, #tpu.memory_space<vmem>>, %arg10: memref<4x1xf32, #tpu.memory_space<vmem>>, %arg11: memref<1x4x128xf32, #tpu.memory_space<vmem>>, %arg12: memref<1x1x1xf32, #tpu.memory_space<vmem>>, %arg13: memref<1x1xf32, #tpu.memory_space<vmem>>) attributes {dimension_semantics = [#tpu.dimension_semantics<parallel>, #tpu.dimension_semantics<arbitrary>], iteration_bounds = array<i64: 2, 2>, scalar_prefetch = 1 : i64, scratch_operands = 1 : i64, tpu.core_type = #tpu.core_type<tc>, window_params = [{transform_indices = @transform_0, window_bounds = array<i64: 1, 4, 128>}, {transform_indices = @transform_1, window_bounds = array<i64: 1, 4, 128>}, {pipeline_mode = #tpu.pipeline_mode<synchronous>, transform_indices = @transform_2, window_bounds = array<i64: 128, 128>}, {pipeline_mode = #tpu.pipeline_mode<synchronous>, transform_indices = @transform_3, window_bounds = array<i64: 32, 8>}, {pipeline_mode = #tpu.pipeline_mode<synchronous>, transform_indices = @transform_4, window_bounds = array<i64: 32, 1>}, {pipeline_mode = #tpu.pipeline_mode<synchronous>, transform_indices = @transform_5, window_bounds = array<i64: 32, 1>}, {pipeline_mode = #tpu.pipeline_mode<synchronous>, transform_indices = @transform_6, window_bounds = array<i64: 4, 32>}, {pipeline_mode = #tpu.pipeline_mode<synchronous>, transform_indices = @transform_7, window_bounds = array<i64: 4, 1>}, {transform_indices = @transform_8, window_bounds = array<i64: 1, 4, 128>}, {transform_indices = @transform_9, window_bounds = array<i64: 1, 1, 1>}]} {
    %0 = arith.index_cast %arg0 : i32 to index
    %1 = memref.load %arg2[%0] : memref<2xf32, #tpu.memory_space<smem>>
    %2 = vector.broadcast %1 : f32 to vector<1x1xf32>
    %cst = arith.constant 5.000000e-01 : f32
    %cst_0 = arith.constant 5.000000e-01 : f32
    %3 = arith.mulf %cst, %cst_0 : f32
    %4 = arith.mulf %2, %2 : vector<1x1xf32>
    %c0 = arith.constant 0 : index
    %c0_1 = arith.constant 0 : index
    %c0_2 = arith.constant 0 : index
    %5 = vector.load %arg3[%c0, %c0_1, %c0_2] : memref<1x4x128xf32, #tpu.memory_space<vmem>>, vector<1x4x128xf32>
    %6 = vector.shape_cast %5 : vector<1x4x128xf32> to vector<4x128xf32>
    %c0_3 = arith.constant 0 : index
    %c0_4 = arith.constant 0 : index
    %c0_5 = arith.constant 0 : index
    %7 = vector.load %arg4[%c0_3, %c0_4, %c0_5] : memref<1x4x128xf32, #tpu.memory_space<vmem>>, vector<1x4x128xf32>
    %8 = vector.shape_cast %7 : vector<1x4x128xf32> to vector<4x128xf32>
    %c0_6 = arith.constant 0 : index
    %c0_7 = arith.constant 0 : index
    %9 = vector.load %arg5[%c0_6, %c0_7] : memref<128x128xf32, #tpu.memory_space<vmem>>, vector<128x128xf32>
    %cst_8 = arith.constant dense<0.000000e+00> : vector<4x128xf32>
    %10 = tpu.matmul %6, %9, %cst_8 {dimension_numbers = #tpu.dot_dimension_numbers<[1], [0], [0], [1], [0, 0, 1, 1], [], []>} : vector<4x128xf32>, vector<128x128xf32>, vector<4x128xf32> -> vector<4x128xf32>
    %c0_9 = arith.constant 0 : index
    %c0_10 = arith.constant 0 : index
    %c0_11 = arith.constant 0 : index
    %11 = vector.load %arg11[%c0_9, %c0_10, %c0_11] : memref<1x4x128xf32, #tpu.memory_space<vmem>>, vector<1x4x128xf32>
    %12 = vector.shape_cast %11 : vector<1x4x128xf32> to vector<4x128xf32>
    %13 = vector.shape_cast %10 : vector<4x128xf32> to vector<1x4x128xf32>
    tpu.vector_store %arg11[%c0_9, %c0_10, %c0_11], %13 {strides = array<i32>} : memref<1x4x128xf32, #tpu.memory_space<vmem>>, vector<1x4x128xf32>,
    %14 = vector.broadcast %2 : vector<1x1xf32> to vector<4x128xf32>
    %15 = arith.mulf %14, %8 : vector<4x128xf32>
    %16 = arith.addf %6, %15 : vector<4x128xf32>
    %17 = vector.broadcast %3 : f32 to vector<1x1xf32>
    %18 = arith.addf %4, %17 : vector<1x1xf32>
    %19 = math.rsqrt %18 : vector<1x1xf32>
    %20 = vector.broadcast %3 : f32 to vector<1x1xf32>
    %21 = arith.addf %4, %20 : vector<1x1xf32>
    %22 = vector.broadcast %3 : f32 to vector<1x1xf32>
    %23 = arith.divf %22, %21 : vector<1x1xf32>
    %cst_12 = arith.constant 5.000000e-01 : f32
    %24 = vector.broadcast %cst_12 : f32 to vector<1x1xf32>
    %25 = arith.mulf %2, %24 : vector<1x1xf32>
    %26 = arith.mulf %25, %19 : vector<1x1xf32>
    %27 = math.log %2 : vector<1x1xf32>
    %cst_13 = arith.constant 2.500000e-01 : f32
    %28 = vector.broadcast %cst_13 : f32 to vector<1x1xf32>
    %29 = arith.mulf %27, %28 : vector<1x1xf32>
    %30 = vector.broadcast %19 : vector<1x1xf32> to vector<4x128xf32>
    %31 = arith.mulf %30, %16 : vector<4x128xf32>
    %32 = tpu.concatenate %31, %10 in 0 : vector<4x128xf32>, vector<4x128xf32> -> vector<8x128xf32>
    %c0_14 = arith.constant 0 : index
    %c0_15 = arith.constant 0 : index
    %33 = vector.load %arg6[%c0_14, %c0_15] : memref<32x8xf32, #tpu.memory_space<vmem>>, vector<32x8xf32>
    %cst_16 = arith.constant dense<0.000000e+00> : vector<32x128xf32>
    %34 = tpu.matmul %33, %32, %cst_16 {dimension_numbers = #tpu.dot_dimension_numbers<[1], [0], [0], [1], [0, 0, 1, 1], [], []>} : vector<32x8xf32>, vector<8x128xf32>, vector<32x128xf32> -> vector<32x128xf32>
    %c0_17 = arith.constant 0 : index
    %c0_18 = arith.constant 0 : index
    %35 = vector.load %arg7[%c0_17, %c0_18] : memref<32x1xf32, #tpu.memory_space<vmem>>, vector<32x1xf32>
    %36 = vector.broadcast %35 : vector<32x1xf32> to vector<32x128xf32>
    %37 = arith.addf %34, %36 : vector<32x128xf32>
    %c0_19 = arith.constant 0 : index
    %c0_20 = arith.constant 0 : index
    %38 = vector.load %arg8[%c0_19, %c0_20] : memref<32x1xf32, #tpu.memory_space<vmem>>, vector<32x1xf32>
    %39 = vector.broadcast %29 : vector<1x1xf32> to vector<32x1xf32>
    %40 = arith.mulf %39, %38 : vector<32x1xf32>
    %41 = vector.broadcast %40 : vector<32x1xf32> to vector<32x128xf32>
    %42 = arith.addf %37, %41 : vector<32x128xf32>
    %43 = arith.mulf %42, %42 : vector<32x128xf32>
    %44 = arith.mulf %42, %43 : vector<32x128xf32>
    %cst_21 = arith.constant 4.471500e-02 : f32
    %45 = vector.broadcast %cst_21 : f32 to vector<32x128xf32>
    %46 = arith.mulf %45, %44 : vector<32x128xf32>
    %47 = arith.addf %42, %46 : vector<32x128xf32>
    %cst_22 = arith.constant 0.797884583 : f32
    %48 = vector.broadcast %cst_22 : f32 to vector<32x128xf32>
    %49 = arith.mulf %48, %47 : vector<32x128xf32>
    %50 = math.tanh %49 : vector<32x128xf32>
    %cst_23 = arith.constant 1.000000e+00 : f32
    %51 = vector.broadcast %cst_23 : f32 to vector<32x128xf32>
    %52 = arith.addf %51, %50 : vector<32x128xf32>
    %cst_24 = arith.constant 5.000000e-01 : f32
    %53 = vector.broadcast %cst_24 : f32 to vector<32x128xf32>
    %54 = arith.mulf %53, %52 : vector<32x128xf32>
    %55 = arith.mulf %42, %54 : vector<32x128xf32>
    %c0_25 = arith.constant 0 : index
    %c0_26 = arith.constant 0 : index
    %56 = vector.load %arg9[%c0_25, %c0_26] : memref<4x32xf32, #tpu.memory_space<vmem>>, vector<4x32xf32>
    %cst_27 = arith.constant dense<0.000000e+00> : vector<4x128xf32>
    %57 = tpu.matmul %56, %55, %cst_27 {dimension_numbers = #tpu.dot_dimension_numbers<[1], [0], [0], [1], [0, 0, 1, 1], [], []>} : vector<4x32xf32>, vector<32x128xf32>, vector<4x128xf32> -> vector<4x128xf32>
    %c0_28 = arith.constant 0 : index
    %c0_29 = arith.constant 0 : index
    %58 = vector.load %arg10[%c0_28, %c0_29] : memref<4x1xf32, #tpu.memory_space<vmem>>, vector<4x1xf32>
    %59 = vector.broadcast %58 : vector<4x1xf32> to vector<4x128xf32>
    %60 = arith.addf %57, %59 : vector<4x128xf32>
    %61 = vector.broadcast %23 : vector<1x1xf32> to vector<4x128xf32>
    %62 = arith.mulf %61, %16 : vector<4x128xf32>
    %63 = vector.broadcast %26 : vector<1x1xf32> to vector<4x128xf32>
    %64 = arith.mulf %63, %60 : vector<4x128xf32>
    %65 = arith.addf %62, %64 : vector<4x128xf32>
    %cst_30 = arith.constant -1.000000e+00 : f32
    %cst_31 = arith.constant 1.000000e+00 : f32
    %66 = vector.broadcast %cst_30 : f32 to vector<4x128xf32>
    %67 = arith.maximumf %66, %65 : vector<4x128xf32>
    %68 = vector.broadcast %cst_31 : f32 to vector<4x128xf32>
    %69 = arith.minimumf %68, %67 : vector<4x128xf32>
    %c0_i32 = arith.constant 0 : i32
    %70 = arith.cmpi eq, %arg1, %c0_i32 : i32
    %71 = arith.extui %70 : i1 to i32
    %c0_i32_32 = arith.constant 0 : i32
    %72 = arith.cmpi ne, %71, %c0_i32_32 : i32
    scf.if %72 {
      %cst_39 = arith.constant 0.000000e+00 : f32
      %86 = vector.broadcast %cst_39 : f32 to vector<1x1xf32>
      %c0_40 = arith.constant 0 : index
      %c0_41 = arith.constant 0 : index
      %87 = vector.load %arg13[%c0_40, %c0_41] : memref<1x1xf32, #tpu.memory_space<vmem>>, vector<1x1xf32>
      tpu.vector_store %arg13[%c0_40, %c0_41], %86 {strides = array<i32>} : memref<1x1xf32, #tpu.memory_space<vmem>>, vector<1x1xf32>,
    } else {
    }
    %73 = arith.subf %69, %6 : vector<4x128xf32>
    %c0_33 = arith.constant 0 : index
    %c0_34 = arith.constant 0 : index
    %74 = vector.load %arg13[%c0_33, %c0_34] : memref<1x1xf32, #tpu.memory_space<vmem>>, vector<1x1xf32>
    %75 = arith.mulf %73, %73 : vector<4x128xf32>
    %76 = vector.shape_cast %75 : vector<4x128xf32> to vector<1x4x128xf32>
    %cst_35 = arith.constant dense<0.000000e+00> : vector<1xf32>
    %77 = vector.multi_reduction <add>, %76, %cst_35 [1, 2] : vector<1x4x128xf32> to vector<1xf32>
    %78 = vector.shape_cast %77 : vector<1xf32> to vector<1x1x1xf32>
    %79 = vector.extract %78[0, 0, 0] : f32 from vector<1x1x1xf32>
    %80 = vector.broadcast %79 : f32 to vector<1x1xf32>
    %81 = arith.addf %74, %80 : vector<1x1xf32>
    %c0_36 = arith.constant 0 : index
    %c0_37 = arith.constant 0 : index
    %82 = vector.load %arg13[%c0_36, %c0_37] : memref<1x1xf32, #tpu.memory_space<vmem>>, vector<1x1xf32>
    tpu.vector_store %arg13[%c0_36, %c0_37], %81 {strides = array<i32>} : memref<1x1xf32, #tpu.memory_space<vmem>>, vector<1x1xf32>,
    %c1_i32 = arith.constant 1 : i32
    %83 = arith.cmpi eq, %arg1, %c1_i32 : i32
    %84 = arith.extui %83 : i1 to i32
    %c0_i32_38 = arith.constant 0 : i32
    %85 = arith.cmpi ne, %84, %c0_i32_38 : i32
    scf.if %85 {
      %86 = vector.broadcast %3 : f32 to vector<1x1xf32>
      %87 = arith.addf %4, %86 : vector<1x1xf32>
      %88 = vector.broadcast %3 : f32 to vector<1x1xf32>
      %89 = arith.mulf %4, %88 : vector<1x1xf32>
      %90 = arith.divf %87, %89 : vector<1x1xf32>
      %c0_39 = arith.constant 0 : index
      %c0_40 = arith.constant 0 : index
      %91 = vector.load %arg13[%c0_39, %c0_40] : memref<1x1xf32, #tpu.memory_space<vmem>>, vector<1x1xf32>
      %cst_41 = arith.constant 9.765625E-4 : f32
      %92 = vector.broadcast %cst_41 : f32 to vector<1x1xf32>
      %93 = arith.mulf %91, %92 : vector<1x1xf32>
      %94 = arith.mulf %93, %90 : vector<1x1xf32>
      %c0_42 = arith.constant 0 : index
      %c0_43 = arith.constant 0 : index
      %c0_44 = arith.constant 0 : index
      %95 = vector.load %arg12[%c0_42, %c0_43, %c0_44] : memref<1x1x1xf32, #tpu.memory_space<vmem>>, vector<1x1x1xf32>
      %96 = vector.shape_cast %95 : vector<1x1x1xf32> to vector<1x1xf32>
      %97 = vector.shape_cast %94 : vector<1x1xf32> to vector<1x1x1xf32>
      tpu.vector_store %arg12[%c0_42, %c0_43, %c0_44], %97 {strides = array<i32>} : memref<1x1x1xf32, #tpu.memory_space<vmem>>, vector<1x1x1xf32>,
    } else {
    }
    return
  }
  func.func @transform_0(%arg0: i32, %arg1: i32, %arg2: memref<2xf32, #tpu.memory_space<smem>>) -> (i32, i32, i32) {
    %c0_i32 = arith.constant 0 : i32
    %c0_i32_0 = arith.constant 0 : i32
    return %arg0, %c0_i32, %arg1 : i32, i32, i32
  }
  func.func @transform_1(%arg0: i32, %arg1: i32, %arg2: memref<2xf32, #tpu.memory_space<smem>>) -> (i32, i32, i32) {
    %c0_i32 = arith.constant 0 : i32
    %c0_i32_0 = arith.constant 0 : i32
    return %arg0, %c0_i32, %arg1 : i32, i32, i32
  }
  func.func @transform_2(%arg0: i32, %arg1: i32, %arg2: memref<2xf32, #tpu.memory_space<smem>>) -> (i32, i32) {
    %c0_i32 = arith.constant 0 : i32
    %c0_i32_0 = arith.constant 0 : i32
    %c0_i32_1 = arith.constant 0 : i32
    return %c0_i32, %c0_i32_0 : i32, i32
  }
  func.func @transform_3(%arg0: i32, %arg1: i32, %arg2: memref<2xf32, #tpu.memory_space<smem>>) -> (i32, i32) {
    %c0_i32 = arith.constant 0 : i32
    %c0_i32_0 = arith.constant 0 : i32
    %c0_i32_1 = arith.constant 0 : i32
    return %c0_i32, %c0_i32_0 : i32, i32
  }
  func.func @transform_4(%arg0: i32, %arg1: i32, %arg2: memref<2xf32, #tpu.memory_space<smem>>) -> (i32, i32) {
    %c0_i32 = arith.constant 0 : i32
    %c0_i32_0 = arith.constant 0 : i32
    %c0_i32_1 = arith.constant 0 : i32
    return %c0_i32, %c0_i32_0 : i32, i32
  }
  func.func @transform_5(%arg0: i32, %arg1: i32, %arg2: memref<2xf32, #tpu.memory_space<smem>>) -> (i32, i32) {
    %c0_i32 = arith.constant 0 : i32
    %c0_i32_0 = arith.constant 0 : i32
    %c0_i32_1 = arith.constant 0 : i32
    return %c0_i32, %c0_i32_0 : i32, i32
  }
  func.func @transform_6(%arg0: i32, %arg1: i32, %arg2: memref<2xf32, #tpu.memory_space<smem>>) -> (i32, i32) {
    %c0_i32 = arith.constant 0 : i32
    %c0_i32_0 = arith.constant 0 : i32
    %c0_i32_1 = arith.constant 0 : i32
    return %c0_i32, %c0_i32_0 : i32, i32
  }
  func.func @transform_7(%arg0: i32, %arg1: i32, %arg2: memref<2xf32, #tpu.memory_space<smem>>) -> (i32, i32) {
    %c0_i32 = arith.constant 0 : i32
    %c0_i32_0 = arith.constant 0 : i32
    %c0_i32_1 = arith.constant 0 : i32
    return %c0_i32, %c0_i32_0 : i32, i32
  }
  func.func @transform_8(%arg0: i32, %arg1: i32, %arg2: memref<2xf32, #tpu.memory_space<smem>>) -> (i32, i32, i32) {
    %c0_i32 = arith.constant 0 : i32
    %c0_i32_0 = arith.constant 0 : i32
    return %arg0, %c0_i32, %arg1 : i32, i32, i32
  }
  func.func @transform_9(%arg0: i32, %arg1: i32, %arg2: memref<2xf32, #tpu.memory_space<smem>>) -> (i32, i32, i32) {
    %c0_i32 = arith.constant 0 : i32
    %c0_i32_0 = arith.constant 0 : i32
    %c0_i32_1 = arith.constant 0 : i32
    return %arg0, %c0_i32, %c0_i32_0 : i32, i32, i32
  }
}

</mosaic_0001>

<bundles_post_ra>
// kernel: tpu_custom_call.1
= control target key start
LH: loop header
LB: loop body
LE: loop exit
PB: predicated region body
PF: predicated region fallthrough
CT: control target
= control target key end

     0   :  { %s1152_s16 = smov [#allocation4]   ;;  %s1481_s0 = inlined_call_operand.vmem [shape: f32[2], index: 0, kind: input, shape index: {}]   ;;  %s1482_s1 = inlined_call_operand.vmem [shape: f32[2,4,256], index: 1, kind: input, shape index: {}]   ;;  %s1483_s2 = inlined_call_operand.vmem [shape: f32[2,4,256], index: 2, kind: input, shape index: {}]   ;;  %s1484_s3 = inlined_call_operand.hbm [shape: f32[128,128], index: 3, kind: input, shape index: {}]   ;;  %s1485_s4 = inlined_call_operand.vmem [shape: f32[32,8], index: 4, kind: input, shape index: {}]   ;;  %s1486_s5 = inlined_call_operand.vmem [shape: f32[32,1], index: 5, kind: input, shape index: {}]   ;;  %s1487_s6 = inlined_call_operand.vmem [shape: f32[32,1], index: 6, kind: input, shape index: {}]   ;;  %s1488_s7 = inlined_call_operand.vmem [shape: f32[4,32], index: 7, kind: input, shape index: {}]   ;;  %s1489_s8 = inlined_call_operand.vmem [shape: f32[4,1], index: 8, kind: input, shape index: {}]   ;;  %s1490_s9 = inlined_call_operand.hbm [shape: f32[2,4,256], index: 9, kind: output, shape index: {0}]   ;;  %s1491_s10 = inlined_call_operand.vmem [shape: f32[2,1,1], index: 10, kind: output, shape index: {1}]  }
   0x1   :  { %1497 = sst [smem:[#allocation15_spill]] %s1482_s1  ;;  %s17_s15 = sshll.u32 %s1481_s0, 4  ;;  %s18_s15 = int_to_ptr.vmem [resolvable:$true] %s17_s15 }
   0x2   :  { %1498 = sst [smem:[#allocation16_spill]] %s1483_s2 }
   0x3   :  { %1499 = sst [smem:[#allocation17_spill]] %s1484_s3 }
   0x4   :  { %20 = dma.vmem_to_smem %s18_s15, 16, %s1152_s16, [#allocation3] }
   0x5   :  { %1110 = dma.done.wait [#allocation3], 16 }
   0x6   :  { %1111 = vsyncadd [#allocation3], 4294967280 }
   0x7   :  { %23 = sfence }
   0x8   :  { %24 = vsyncpa [#allocation6], 0 }
   0x9   :  { %25 = vsyncpa [#allocation7], 0 }
   0xa   :  { %27 = vsyncpa [#allocation7 + $0x1], 0  ;;  %s1216_s17 = smov 0   ;;  %s1218_s18 = smov 0  }
   0xb   :  { %s1220_s19 = smov 0   ;;  %s1222_s20 = smov 0  }
   0xc   :  { %s1224_s21 = smov 0   ;;  %s1226_s0 = smov 0  }
   0xd   :  { %s1228_s22 = smov 0   ;;  %s1230_s23 = smov 0  }
   0xe LB: > { %1500 = sst [smem:[#allocation12_spill]] %s1142_s0  ;;  %s875_s24 = sadd.s32 4294967295, %s1150_s23   ;;  %s1150_s23 = sphi %s1230_s23, %s33_s23   ;;  %s1146_s22 = sphi %s1228_s22, %s1523_s22   ;;  %s1142_s0 = sphi %s1226_s0, %s1522_s0   ;;  %s1138_s21 = sphi %s1224_s21, %s1521_s21   ;;  %s1134_s20 = sphi %s1222_s20, %s1515_s20   ;;  %s1130_s19 = sphi %s1220_s19, %s1520_s19   ;;  %s1126_s18 = sphi %s1218_s18, %s1519_s18   ;;  %s1122_s17 = sphi %s1216_s17, %s1518_s17  }
   0xf   : > { %s876_s25 = sadd.s32 4294967294, %s1150_s23   ;;  %s42_s26 = sadd.s32 1, %s1142_s0 }
  0x10   : > { %s45_s27 = sadd.s32 1, %s1146_s22  ;;  %p43_p0 = scmp.ge.s32.totalorder %s42_s26, 2 }
  0x11   : > { %s236_s28 = sadd.s32 1, %s1130_s19  ;;  %p246_p1 = scmp.ne.s32.totalorder %s1130_s19, %s1126_s18 }
  0x12   : > { %p247_p2 = scmp.eq.s32.totalorder %s875_s24, 3  ;;  %s1525_s26 = smov (%p43_p0, %s42_s26), 0 }
  0x13   : > { %1501 = sst [smem:[#allocation13_spill]] %s1525_s26  ;;  %s1527_s27 = smov (!%p43_p0, %s45_s27), %s1146_s22 }
  0x14   : > { %s232_s29 = ssub.s32 %s1142_s0, %s1525_s26  ;;  %p1268_p3 = por %p247_p2, %p246_p1 }
  0x15   : > { %p47_p4 = scmp.ge.s32.totalorder %s1527_s27, 2  ;;  %p252_p5 = scmp.ne.s32.totalorder %s1126_s18, %s1122_s17 }
  0x16   : > { %p253_p6 = scmp.eq.s32.totalorder %s876_s25, 3  ;;  %p877_p7 = scmp.ge.s32.totalorder %s1150_s23, 1 }
  0x17   : > { %s1529_s27 = smov (%p47_p4, %s1527_s27), 0  ;;  %p286_p9 = scmp.lt.s32.totalorder %s1150_s23, 5 }
  0x18   : > { %1503 = sst [smem:[#allocation14_spill]] %s1529_s27  ;;  %p1277_p8 = por %p253_p6, %p252_p5 }
  0x19   : > { %s231_s12 = ssub.s32 %s1146_s22, %s1529_s27  ;;  %p1284_p10 = pnand %p877_p7, %p286_p9 }
  0x1a   : > { %s233_s13 = sor.u32 %s232_s29, %s231_s12  ;;  %p1288_p12 = scmp.eq.s32.totalorder %s875_s24, 0 }
  0x1b   : > { %p234_p11 = scmp.eq.s32.totalorder %s233_s13, 0  ;;  %p908_p13 = pneg %p1284_p10 }
  0x1c   : > { %s1507_s3 = sld [smem:[#allocation17_spill]]  ;;  %s1153_s29 = smov [#allocation5]  }
  0x1d   : > { %s1298_s0 = scalar_select %p234_p11, %s1130_s19, %s236_s28  }
  0x1e   : > { %s299_s12 = sshll.u32 %s1153_s29, 4  ;;  %p909_p0 = pnand %p1288_p12, %p908_p13  ;;  %s300_s12 = int_to_ptr.vmem [resolvable:$true] %s299_s12 }
  0x1f   : > { %s1154_s13 = smov 128   ;;  %s1155_s24 = smov 8  }
  0x20   : > { %352 = sbr.rel (%p1284_p10) target bundleno = 753 (0x2f1), region = 52 }
  0x22   : > { %s297_s26 = sshll.u32 %s1507_s3, 4  ;;  %s298_s26 = int_to_ptr.hbm [resolvable:$true] %s297_s26 }
  0x23   : > { %911 = dma.hbm_to_vmem [thread:$0]  (!%p909_p0), %s298_s26, 2048, %s300_s12, [#allocation6], %s1154_s13, %s1154_s13, %s1155_s24  }
  0x25   : > { %1113 = dma.done.wait (%p1288_p12), [#allocation6], 2048  }
  0x26   : > { %1115 = vsyncadd (%p1288_p12), [#allocation6], 4294965248  ;;  %p403_p1 = scmp.lt.s32.totalorder %s1138_s21, 1  ;;  %p405_p2 = scmp.lt.s32.totalorder %s1134_s20, 1  ;;  %v442_v0 = vld [vmem:[#allocation5 + $0x78] sm:$0xff]  ;;  %v441_v1 = vld [vmem:[#allocation5 + $0x70] sm:$0xff] }
  0x27   : > { %s422_s28 = sld [smem:[#allocation4 + %s1138_s21]]  ;;  %443 = vmatpush.msra.mxu0 %v442_v0  ;;  %v440_v4 = vld [vmem:[#allocation5 + $0x68] sm:$0xff]  ;;  %v439_v5 = vld [vmem:[#allocation5 + $0x60] sm:$0xff]  ;;  %v438_v8 = vld [vmem:[#allocation5 + $0x58] sm:$0xff]  ;;  %v1156_v37 = vmov 0   ;;  %vm501_vm6 = vcmask 1043456  }
  0x28   : > { %s1312_s16 = scalar_select %p403_p1, %s1138_s21, 1  ;;  %v437_v11 = vld [vmem:[#allocation5 + $0x50] sm:$0xff]  ;;  %v436_v13 = vld [vmem:[#allocation5 + $0x48] sm:$0xff]  ;;  %v435_v15 = vld [vmem:[#allocation5 + $0x40] sm:$0xff]  ;;  %990 = vset.pattern.permute.xlu1 %v1156_v37  ;;  %989 = vset.pattern.permute.xlu0 %v1156_v37  ;;  %vm531_vm7 = vcmask 64512   ;;  %vm648_vm8 = vcmask 261120  }
  0x29   : > { %s406_s26 = scalar_select %p405_p2, %s1134_s20, 1  ;;  %444 = vmatpush.msra.mxu0 %v441_v1  ;;  %v434_v17 = vld [vmem:[#allocation5 + $0x38] sm:$0xff]  ;;  %v433_v22 = vld [vmem:[#allocation5 + $0x30] sm:$0xff]  ;;  %v432_v24 = vld [vmem:[#allocation5 + $0x28] sm:$0xff]  ;;  %991 = vset.pattern.permute.xlu2 %v1156_v37 }
  0x2a   : > { %s883_s14 = sshll.u32 %s1312_s16, 1  ;;  %s1508_s2 = sld [smem:[#allocation16_spill]]  ;;  %v431_v27 = vld [vmem:[#allocation5 + $0x20] sm:$0xff]  ;;  %v430_v29 = vld [vmem:[#allocation5 + $0x18] sm:$0xff]  ;;  %v429_v32 = vld [vmem:[#allocation5 + $0x10] sm:$0xff] }
  0x2b   : > { %s408_s15 = sadd.s32 %s883_s14, %s406_s26  ;;  %s1509_s1 = sld [smem:[#allocation15_spill]]  ;;  %445 = vmatpush.msra.mxu0 %v440_v4  ;;  %v428_v34 = vld [vmem:[#allocation5 + $0x8] sm:$0xff]  ;;  %v427_v35 = vld [vmem:[#allocation5] sm:$0xff]  ;;  %v510_v41 = vld [vmem:[%s1486_s5 + $0x18] sm:$0xff] }
  0x2c   : > { %s884_s13 = sshll.u32 %s408_s15, 2  ;;  %v508_v38 = vld [vmem:[%s1486_s5 + $0x8] sm:$0xff]  ;;  %v576_v42 = vld [vmem:[%s1487_s6 + $0x18] sm:$0xff]  ;;  %528 = vperm.xlu0 %989, %v510_v41   ;;  %v509_v47 = vld [vmem:[%s1486_s5 + $0x10] sm:$0xff]  ;;  %p893_p4 = scmp.ne.s32.totalorder %s1134_s20, 0 }
  0x2d   : > { %v1320_v2 = vstv %s422_s28  ;;  %446 = vmatpush.msra.mxu0 %v439_v5  ;;  %518 = vperm.xlu1 %990, %v508_v38   ;;  %v573_v48 = vld [vmem:[%s1487_s6] sm:$0xff]  ;;  %v574_v52 = vld [vmem:[%s1487_s6 + $0x8] sm:$0xff]  ;;  %s1495_s28 = sand.u32 1, %s1126_s18   ;;  %v575_v56 = vld [vmem:[%s1487_s6 + $0x10] sm:$0xff] }
  0x2e   : > { %v1324_v3 = vmul.f32 %v1320_v2, %v1320_v2  ;;  %s1384_s14 = sshll.u32 %s1495_s28, 2  ;;  %v503_v61 = vld [vmem:[%s1485_s4] sm:$0xff]  ;;  %v504_v0 = vld [vmem:[%s1485_s4 + $0x8] sm:$0xff]  ;;  %v505_v4 = vld [vmem:[%s1485_s4 + $0x10] sm:$0xff] }
  0x2f   : > { %447 = vmatpush.msra.mxu0 %v438_v8  ;;  %s1496_s24 = scalar_lea.vmem [#allocation8], %s1384_s14  ;;  %v507_v63 = vld [vmem:[%s1486_s5] sm:$0xff]  ;;  %v506_v5 = vld [vmem:[%s1485_s4 + $0x18] sm:$0xff] }
  0x30   : > { %s418_s27 = scalar_lea.vmem %s1508_s2, %s884_s13  ;;  %v1333_v6 = vadd.f32 0.25, %v1324_v3  ;;  %v642_v1 = vld [vmem:[%s1489_s8] sm:$0xf] }
  0x31   : > { %s410_s26 = scalar_lea.vmem %s1509_s1, %s884_s13  ;;  %v426_v7 = vld [vmem:[%s418_s27] sm:$0xf]  ;;  %448 = vmatpush.msra.mxu0 %v437_v11 }
  0x32   : > { %v464_v9 = vmul.f32 %v426_v7, %v1320_v2  ;;  %992 = vrcp.f32 %v1333_v6  ;;  %v1337_v10 = vld [vmem:[%s410_s26] sm:$0xf]  ;;  %vm473_vm0 = vweird.f32 %v1333_v6  ;;  %v488_v19 = vand.u32 2147483648, %v1333_v6 }
  0x33   : > { %449 = vmatpush.msra.mxu0 %v436_v13  ;;  %v486_v21 = vand.u32 2147483647, %v1333_v6  ;;  %994 = vlog2.f32 %v1320_v2 }
  0x34   : > { %v1340_v12 = vadd.f32 %v464_v9, %v1337_v10  ;;  %v489_v25 = vor.u32 1.1754944e-38, %v488_v19  ;;  %996 = vrsqrt.f32 %v1333_v6  ;;  %523 = vperm.xlu0 %989, %v509_v47  }
  0x35   : > { %450 = vmatpush.msra.mxu0 %v435_v15  ;;  %vm487_vm3 = vcmp.eq.f32.partialorder %v486_v21, 8.507059e+37 }
  0x37   : > { %451 = vmatpush.msra.mxu0 %v434_v17 }
  0x38   : > { %v993_v14 = vpop.eup %992 }
  0x39   : > { %v478_v16 = vmul.f32 %v993_v14, %v1333_v6  ;;  %vm483_vm1 = vweird.f32 %v993_v14  ;;  %452 = vmatpush.msra.mxu0 %v433_v22  ;;  %v995_v36 = vpop.eup %994 }
  0x3a   : > { %vm1346_vm2 = vmor %vm473_vm0, %vm483_vm1  ;;  %v495_v39 = vmul.f32 0.6931472, %v995_v36  ;;  %v997_v40 = vpop.eup %996 }
  0x3b   : > { %v479_v20 = vsub.f32 1.0, %v478_v16  ;;  %453 = vmatpush.msra.mxu0 %v432_v24  ;;  %v468_v44 = vmul.f32 %v997_v40, %v1333_v6  ;;  %vm474_vm4 = vweird.f32 %v997_v40 }
  0x3c   : > { %v496_v43 = vmul.f32 0.25, %v495_v39  ;;  %vm475_vm5 = vmor %vm473_vm0, %vm474_vm4 }
  0x3d   : > { %v480_v23 = vmul.f32 %v993_v14, %v479_v20  ;;  %454 = vmatpush.msra.mxu0 %v431_v27  ;;  %v469_v46 = vmul.f32 %v997_v40, %v468_v44 }
  0x3e   : > { %v580_v45 = vmul.f32 %v576_v42, %v496_v43  ;;  %v577_v49 = vmul.f32 %v573_v48, %v496_v43  ;;  %v578_v53 = vmul.f32 %v574_v52, %v496_v43  ;;  %v579_v57 = vmul.f32 %v575_v56, %v496_v43 }
  0x3f   : > { %v481_v26 = vadd.f32 %v993_v14, %v480_v23  ;;  %455 = vmatpush.msra.mxu0 %v430_v29  ;;  %v470_v50 = vmul.f32 0.5, %v469_v46 }
  0x40   : > { %598 = vperm.xlu1 %990, %v580_v45   ;;  %588 = vperm.xlu0 %989, %v578_v53  }
  0x41   : > { %v485_v28 = vsel %vm1346_vm2, %v993_v14, %v481_v26  ;;  %456 = vmatpush.msra.mxu0 %v429_v32  ;;  %v471_v51 = vsub.f32 1.5, %v470_v50  ;;  %593 = vperm.xlu2 %991, %v579_v57  }
  0x42   : > { %v490_v30 = vsel %vm487_vm3, %v489_v25, %v485_v28 }
  0x43   : > { %v491_v31 = vmul.f32 0.25, %v490_v30  ;;  %457 = vmatpush.msra.mxu0 %v428_v34  ;;  %v472_v54 = vmul.f32 %v997_v40, %v471_v51 }
  0x45   : > { %v1355_v33 = vmul.f32 %v491_v31, %v1340_v12  ;;  %458 = vmatpush.msra.mxu0 %v427_v35  ;;  %v1386_v55 = vsel %vm475_vm5, %v997_v40, %v472_v54 }
  0x46   : > { %459 = vmatmul.f32.vlgmr.msra.gmra.mxu0 %v1337_v10  ;;  %v497_v58 = vmul.f32 %v1386_v55, %v1340_v12 }
  0x48   : > { %583 = vperm.xlu1 %990, %v577_v49  }
  0x49   : > { %513 = vperm.xlu2 %991, %v507_v63  }
  0x51   : > { %645 = vperm.xlu2 %991, %v642_v1  }
  0x9b   : > { %v594_v9 = vpop.permute.xlu2 %593 }
  0x9e   : > { %v529_v7 = vpop.permute.xlu0 %528 }
  0x9f   : > { %v519_v8 = vpop.permute.xlu1 %518 }
  0xa3   : > { %v514_v14 = vpop.permute.xlu2 %513 }
  0xa6   : > { %v524_v12 = vpop.permute.xlu0 %523 }
  0xb2   : > { %v599_v13 = vpop.permute.xlu1 %598  ;;  %v589_v18 = vpop.permute.xlu0 %588 }
  0xba   : > { %v584_v19 = vpop.permute.xlu1 %583 }
  0xc3   : > { %v460_v59 = vpop.f32.mrf.mxu0 }
  0xc4   : > { %463 = vst [vmem:[%s1496_s24] sm:$0xf] %v460_v59  ;;  %v499_v60 = vrot.slane %v460_v59, 4 }
  0xc6   : > { %v502_v62 = vsel %vm501_vm6, %v497_v58, %v499_v60 }
  0xc7   : > { %559 = vmatpush.msra.mxu1 %v502_v62 }
  0xc8   : > { %887 = vmatmul.msk.f32.vlgmr.msra.gmra.mxu1 %vm531_vm7, %v503_v61 }
  0xd0   : > { %888 = vmatmul.msk.f32.gmra.mxu1 %vm531_vm7, %v504_v0 }
  0xd8   : > { %889 = vmatmul.msk.f32.gmra.mxu1 %vm531_vm7, %v505_v4  ;;  %v641_v4 = vld [vmem:[%s1488_s7] sm:$0xf] }
  0xe0   : > { %890 = vmatmul.msk.f32.gmra.mxu1 %vm531_vm7, %v506_v5  ;;  %v492_v5 = vmul.f32 0.5, %v1320_v2 }
 0x145   : > { %v561_v11 = vpop.f32.mrf.mxu1 }
 0x146   : > { %v562_v17 = vadd.f32 %v561_v11, %v514_v14 }
 0x148   : > { %v601_v21 = vadd.f32 %v584_v19, %v562_v17 }
 0x14a   : > { %v605_v25 = vmul.f32 %v601_v21, %v601_v21 }
 0x14c   : > { %v609_v29 = vmul.f32 %v605_v25, %v601_v21 }
 0x14d   : > { %v564_v15 = vpop.f32.mrf.mxu1 }
 0x14e   : > { %v565_v16 = vadd.f32 %v564_v15, %v519_v8  ;;  %v613_v36 = vmul.f32 0.044715, %v609_v29  ;;  %v646_v8 = vpop.permute.xlu2 %645 }
 0x150   : > { %v602_v20 = vadd.f32 %v589_v18, %v565_v16  ;;  %v617_v41 = vadd.f32 %v613_v36, %v601_v21 }
 0x152   : > { %v606_v23 = vmul.f32 %v602_v20, %v602_v20  ;;  %v621_v46 = vmul.f32 0.7978846, %v617_v41 }
 0x154   : > { %v610_v27 = vmul.f32 %v606_v23, %v602_v20 }
 0x155   : > { %v567_v22 = vpop.f32.mrf.mxu1 }
 0x156   : > { %v568_v24 = vadd.f32 %v567_v22, %v524_v12  ;;  %v614_v35 = vmul.f32 0.044715, %v610_v27 }
 0x158   : > { %v603_v26 = vadd.f32 %v594_v9, %v568_v24  ;;  %v618_v40 = vadd.f32 %v614_v35, %v602_v20 }
 0x15a   : > { %v607_v28 = vmul.f32 %v603_v26, %v603_v26  ;;  %v622_v45 = vmul.f32 0.7978846, %v618_v40 }
 0x15c   : > { %v611_v30 = vmul.f32 %v607_v28, %v603_v26 }
 0x15d   : > { %v570_v31 = vpop.f32.mrf.mxu1 }
 0x15e   : > { %v571_v32 = vadd.f32 %v570_v31, %v529_v7  ;;  %v615_v34 = vmul.f32 0.044715, %v611_v30  ;;  %v493_v7 = vmul.f32 %v492_v5, %v1386_v55 }
 0x160   : > { %v604_v37 = vadd.f32 %v599_v13, %v571_v32  ;;  %v619_v38 = vadd.f32 %v615_v34, %v603_v26 }
 0x162   : > { %v608_v39 = vmul.f32 %v604_v37, %v604_v37  ;;  %v623_v43 = vmul.f32 0.7978846, %v619_v38 }
 0x164   : > { %v612_v42 = vmul.f32 %v608_v39, %v604_v37  ;;  %998 = vtanh.f32 %v623_v43 }
 0x165   : > { %1000 = vtanh.f32 %v622_v45 }
 0x166   : > { %v616_v44 = vmul.f32 0.044715, %v612_v42  ;;  %1002 = vtanh.f32 %v621_v46 }
 0x168   : > { %v620_v47 = vadd.f32 %v616_v44, %v604_v37 }
 0x16a   : > { %v624_v48 = vmul.f32 0.7978846, %v620_v47  ;;  %v999_v49 = vpop.eup %998 }
 0x16b   : > { %v1001_v50 = vpop.eup %1000  ;;  %v631_v52 = vadd.f32 1.0, %v999_v49 }
 0x16c   : > { %1004 = vtanh.f32 %v624_v48  ;;  %v1003_v51 = vpop.eup %1002  ;;  %v630_v56 = vadd.f32 1.0, %v1001_v50 }
 0x16d   : > { %v635_v58 = vmul.f32 0.5, %v631_v52  ;;  %v629_v59 = vadd.f32 1.0, %v1003_v51 }
 0x16e   : > { %v634_v61 = vmul.f32 0.5, %v630_v56 }
 0x16f   : > { %v639_v62 = vmul.f32 %v635_v58, %v603_v26  ;;  %v633_v63 = vmul.f32 0.5, %v629_v59 }
 0x170   : > { %v638_v0 = vmul.f32 %v634_v61, %v602_v20 }
 0x171   : > { %v637_v1 = vmul.f32 %v633_v63, %v601_v21 }
 0x172   : > { %v1005_v53 = vpop.eup %1004 }
 0x173   : > { %v632_v54 = vadd.f32 1.0, %v1005_v53 }
 0x175   : > { %v636_v57 = vmul.f32 0.5, %v632_v54 }
 0x177   : > { %v640_v60 = vmul.f32 %v636_v57, %v604_v37 }
 0x179   : > { %664 = vmatpush.msra.mxu2 %v640_v60 }
 0x17b   : > { %665 = vmatpush.msra.mxu2 %v639_v62 }
 0x17d   : > { %666 = vmatpush.msra.mxu2 %v638_v0 }
 0x17f   : > { %667 = vmatpush.msra.mxu2 %v637_v1 }
 0x180   : > { %891 = vmatmul.msk.f32.vlgmr.msra.gmra.mxu2 %vm648_vm8, %v641_v4 }
 0x203   : > { %v669_v9 = vpop.f32.mrf.mxu2 }
 0x204   : > { %v670_v11 = vadd.f32 %v669_v9, %v646_v8 }
 0x206   : > { %v673_v12 = vmul.f32 %v670_v11, %v493_v7  ;;  %680 = sbr.rel (%p893_p4) target bundleno = 525 (0x20d), region = 60 }
 0x208   : > { %v674_v13 = vadd.f32 %v673_v12, %v1355_v33 }
 0x20a   : > { %v892_v14 = vclamps-f32 %v674_v13, 1.0 }
 0x20b   : > { %vm681_vm9 = vcmask 0   ;;  %v1157_v15 = vmov 0.0  }
 0x20c   : > { %682 = vst.msk [vmem:[#allocation2] sm:$0x1] %vm681_vm9, %v1157_v15 }
 0x20d PF: > { %v683_v16 = vsub.f32 %v892_v14, %v1337_v10  ;;  %vm698_vm10 = vcmask 0   ;;  %p894_p5 = scmp.ne.s32.totalorder %s1134_s20, 1 }
 0x20e   : > { %s1512_s27 = scalar_lea.vmem (!%p894_p5), %s1491_s10, %s1312_s16 }
 0x20f   : > { %v685_v17 = vmul.f32 %v683_v16, %v683_v16 }
 0x211   : > { %v686_v2 = vsel %vm501_vm6, %v685_v17, 0.0 }
 0x212   : > { %687 = vadd.xlane.f32.xlu0 %v686_v2 }
 0x213   : > { %v684_v23 = vld [vmem:[#allocation2] sm:$0x1] }
 0x285   : > { %v688_v55 = vpop.xlane.xlu0 %687 }
 0x286   : > { %v689_v18 = vrot.slane %v688_v55, 4 }
 0x288   : > { %v690_v19 = vadd.f32 %v689_v18, %v688_v55 }
 0x28a   : > { %v691_v20 = vrot.slane %v690_v19, 2 }
 0x28c   : > { %v692_v21 = vadd.f32 %v691_v20, %v690_v19 }
 0x28e   : > { %v693_v33 = vrot.slane %v692_v21, 1 }
 0x290   : > { %v694_v22 = vadd.f32 %v693_v33, %v692_v21 }
 0x292   : > { %900 = vpush %v694_v22 }
 0x2c3   : > { %s901_s24 = spop %900  ;;  %703 = sbr.rel (%p894_p5) target bundleno = 736 (0x2e0), region = 64 }
 0x2c4   : > { %v696_v24 = vstv %s901_s24 }
 0x2c5   : > { %v697_v25 = vadd.f32 %v696_v24, %v684_v23 }
 0x2c7   : > { %699 = vst.msk [vmem:[#allocation2] sm:$0x1] %vm698_vm10, %v697_v25 }
 0x2c8   : > { %v704_v10 = vmul.f32 0.25, %v1324_v3 }
 0x2ca   : > { %1006 = vrcp.f32 %v704_v10  ;;  %v716_v28 = vand.u32 2147483648, %v704_v10  ;;  %vm710_vm11 = vweird.f32 %v704_v10  ;;  %v714_v30 = vand.u32 2147483647, %v704_v10 }
 0x2cc   : > { %v717_v32 = vor.u32 1.1754944e-38, %v716_v28  ;;  %vm715_vm14 = vcmp.eq.f32.partialorder %v714_v30, 8.507059e+37 }
 0x2ce   : > { %v720_v34 = vld [vmem:[#allocation2] sm:$0x1] }
 0x2cf   : > { %v721_v37 = vmul.f32 0.0009765625, %v720_v34 }
 0x2d0   : > { %v1007_v26 = vpop.eup %1006 }
 0x2d1   : > { %v706_v27 = vmul.f32 %v1007_v26, %v704_v10  ;;  %vm711_vm12 = vweird.f32 %v1007_v26 }
 0x2d2   : > { %vm712_vm13 = vmor %vm710_vm11, %vm711_vm12 }
 0x2d3   : > { %v707_v29 = vsub.f32 1.0, %v706_v27 }
 0x2d5   : > { %v708_v31 = vmul.f32 %v1007_v26, %v707_v29 }
 0x2d7   : > { %v709_v35 = vadd.f32 %v1007_v26, %v708_v31 }
 0x2d9   : > { %v713_v36 = vsel %vm712_vm13, %v1007_v26, %v709_v35 }
 0x2da   : > { %v718_v38 = vsel %vm715_vm14, %v717_v32, %v713_v36 }
 0x2db   : > { %v719_v3 = vmul.f32 %v718_v38, %v1333_v6 }
 0x2dd   : > { %v722_v39 = vmul.f32 %v721_v37, %v719_v3 }
 0x2df   : > { %723 = vst.msk [vmem:[%s1512_s27] sm:$0x1] %vm698_vm10, %v722_v39 }
 0x2e0 PF: > { %s896_s15 = sshll.u32 %s1138_s21, 1  ;;  %s1513_s25 = scalar_lea.vmem [#allocation8], %s1384_s14 }
 0x2e1   : > { %s738_s13 = sadd.s32 %s1134_s20, %s896_s15  ;;  %s742_s29 = sshll.u32 %s1513_s25, 4  ;;  %s743_s29 = int_to_ptr.vmem [resolvable:$true] %s742_s29 }
 0x2e2   : > { %s897_s12 = sshll.u32 %s738_s13, 2  ;;  %s1514_s16 = sand.u32 1, %s1126_s18  }
 0x2e3   : > { %s740_s1 = scalar_lea.hbm %s1490_s9, %s897_s12  ;;  %s725_s26 = scalar_lea.sflag [#allocation7], %s1514_s16 }
 0x2e4   : > { %s744_s2 = sshll.u32 %s740_s1, 4  ;;  %s1070_s14 = scalar_lea.hbm %s1490_s9, 16  ;;  %s745_s2 = int_to_ptr.hbm [resolvable:$true] %s744_s2 }
 0x2e5   : > { %s1064_s3 = sshra.s32 %s745_s2, 4  ;;  %s1065_s3 = int_to_ptr.hbm [resolvable:$true] %s1064_s3 }
 0x2e6   : > { %s1066_s27 = scalar_lea.hbm %s1065_s3, 4  ;;  %p1071_p10 = scmp.lt.s32.totalorder %s1065_s3, %s1490_s9 }
 0x2e7   : > { %p1067_p6 = scmp.ne.s32.totalorder %s1065_s3, %s1066_s27  ;;  %p1072_p11 = scmp.lt.s32.totalorder %s1070_s14, %s1066_s27 }
 0x2e9   : > { %p1068_p7 = pnand %p1067_p6, %p1268_p3  ;;  %p1073_p12 = por %p1072_p11, %p1071_p10 }
 0x2eb   : > { %p1069_p9 = pneg %p1068_p7 }
 0x2ed   : > { %p1074_p13 = pnand %p1073_p12, %p1069_p9 }
 0x2ef   : > { %1077 = shalt.err (!%p1074_p13)
}
 0x2f0   : > { %906 = dma.vmem_to_hbm [thread:$0]  (%p1268_p3), %s743_s29, 64, %s745_s2, %s725_s26  }
 0x2f1 PF: > { %p918_p0 = scmp.ge.s32.totalorder %s1150_s23, 2  ;;  %s759_s1 = sand.u32 1, %s1122_s17  }
 0x2f2   : > { %s760_s25 = scalar_lea.sflag [#allocation7], %s759_s1 }
 0x2f3   : > { %p913_p1 = pnand %p918_p0, %p1277_p8 }
 0x2f5   : > { %p914_p2 = pneg %p913_p1 }
 0x2f7   : > { %1117 = dma.done.wait (%p914_p2), %s760_s25, 64  }
 0x2f8   : > { %1119 = vsyncadd (%p914_p2), %s760_s25, 4294967232  ;;  %s33_s23 = sadd.s32 1, %s1150_s23   ;;  %s1515_s20 = sld [smem:[#allocation12_spill]] }
 0x2f9   : > { %p30_p4 = scmp.ge.s32.totalorder %s33_s23, 6   ;;  %s1516_s2 = sld [smem:[#allocation13_spill]] }
 0x2fa   : > { %s1517_s30 = sld [smem:[#allocation14_spill]]  ;;  %s1518_s17 = smov %s1126_s18 }
 0x2fb   : > { %s1519_s18 = smov %s1130_s19  ;;  %s1520_s19 = smov %s1298_s0 }
 0x2fc   : > { %s1521_s21 = smov %s1146_s22  ;;  %32 = sbr.rel (!%p30_p4) target bundleno = 14 (0xe), region = 115 }
 0x2ff   : > { %s1522_s0 = smov %s1516_s2 }
 0x300   : > { %s1523_s22 = smov %s1517_s30 }
 0x301   :  { %772 = vsyncpa [#allocation6], 1 }
 0x302   :  { %774 = vsyncpa [#allocation6 + $0x1], 1 }
 0x303   :  { %775 = vsyncpa [#allocation7], 1 }
 0x304   :  { %777 = vsyncpa [#allocation7 + $0x1], 1 }

</bundles_post_ra>
